<compile_context>
chip_gen: v6e
topology: v6e:2x2x1
jax: 0.10.0
libtpu: 0.0.40
codegen_flags: <defaults>
</compile_context>

<pallas_src>
import functools
import math

import jax
import jax.numpy as jnp
from jax import lax
from jax.experimental import pallas as pl
from jax.experimental.pallas import tpu as pltpu


def _round_up(x, n):
    return (x + n - 1) // n * n


def _vmem_capacity_bytes():
    """Per-core physical VMEM; conservative fallback if the query fails."""
    try:
        cap = int(getattr(pltpu.get_tpu_info(), "vmem_capacity_bytes", 0))
        if cap > 0:
            return cap
    except Exception:
        pass
    return 64 << 20  # assume the smallest current generation (v7x)


# ----------------------------------------------------------------------------
# Fused backbone-projection (+ optional CircleLoss) kernel.
# ----------------------------------------------------------------------------
def fused_kernel(*refs, gamma, m, num_classes, compute_loss):
    if compute_loss:
        img_ref, wb_ref, wn_ref, labels_ref, feat_ref, lse_ref = refs
    else:
        img_ref, wb_ref, feat_ref = refs

    k = pl.program_id(1)

    @pl.when(k == 0)
    def _init():
        feat_ref[...] = jnp.zeros_like(feat_ref)

    # bf16 MXU contraction, f32 accumulation directly into the resident output.
    feat_ref[...] += jnp.dot(img_ref[...], wb_ref[...],
                             preferred_element_type=jnp.float32)

    @pl.when(k == pl.num_programs(1) - 1)
    def _finalize():
        # ---- L2-normalized embedding (rsqrt goes to the EUP) ----------------
        feat = feat_ref[...]                                   # (bb, NFp) f32
        inv_norm = lax.rsqrt(jnp.maximum(
            jnp.sum(feat * feat, axis=-1, keepdims=True), 1e-24))
        feat = feat * inv_norm
        feat_ref[...] = feat

        if compute_loss:
            # ---- cosine logits: native bf16 MXU matmul on the pre-normalized,
            # pre-transposed class weight; f32 accumulation -------------------
            logits = jnp.dot(feat.astype(jnp.bfloat16), wn_ref[...],
                             preferred_element_type=jnp.float32)
            logits = jnp.clip(logits, -1.0, 1.0)               # (bb, NCp)

            bb, ncp = logits.shape
            labels = labels_ref[...]                           # (bb, 1) int32
            class_ids = lax.broadcasted_iota(jnp.int32, (bb, ncp), 1)
            p_mask = class_ids == labels                       # one True / row
            valid = class_ids < num_classes                    # mask NC padding

            alpha_p = jnp.maximum(-logits + 1.0 + m, 0.0)
            alpha_n = jnp.maximum(logits + m, 0.0)
            logit_p = alpha_p * (logits - (1.0 - m)) * gamma
            logit_n = alpha_n * (logits - m) * gamma
            mod = jnp.where(p_mask, logit_p, logit_n)
            mod = jnp.where(valid, mod, jnp.float32(-1e30))

            # logits[p_index] -> one scalar per row, then row-wise logsumexp
            s_p = jnp.sum(jnp.where(p_mask, mod, 0.0), axis=-1, keepdims=True)
            diff = mod - s_p
            mx = jnp.max(diff, axis=-1, keepdims=True)
            lse_ref[...] = mx + jnp.log(
                jnp.sum(jnp.exp(diff - mx), axis=-1, keepdims=True))


# ----------------------------------------------------------------------------
# Spatial attention map: channel-mean + softmax over positions (separate tiny
# kernel so the (B, C, HW) tensor is not resident during the K loop).
# ----------------------------------------------------------------------------
def attn_kernel(img_ref, attn_ref):
    x = img_ref[...].astype(jnp.float32)                       # (bb, C, HW)
    a = jnp.mean(x, axis=1)                                    # (bb, HW)
    a = a - jnp.max(a, axis=-1, keepdims=True)
    e = jnp.exp(a)
    attn_ref[...] = e * pl.reciprocal(
        jnp.sum(e, axis=-1, keepdims=True), approx=True)


# ----------------------------------------------------------------------------
# Wrapper
# ----------------------------------------------------------------------------
def _pick_k_tile(K, nf_pad, requested, tile_budget_bytes):
    """Largest K tile (multiple of 128, dividing K) whose double-buffered bf16
    weight tile fits the per-generation budget."""
    if requested is not None:
        if requested != K:
            assert K % requested == 0 and requested % 128 == 0
        return requested
    if K % 128 != 0 or 2 * K * nf_pad * 2 <= tile_budget_bytes:
        return K
    for cand in range(K - 128, 0, -128):
        if K % cand == 0 and 2 * cand * nf_pad * 2 <= tile_budget_bytes:
            return cand
    return 128


def recog_forward(imgs, labels, cls_weight_norm_t, backbone_weight_knf,
                  gamma, m, num_classes, num_features, k_tile=None):
    compute_loss = labels is not None
    B, C, H, W = imgs.shape
    HW = H * W
    K = C * HW
    nf_pad = backbone_weight_knf.shape[1]
    nc_pad = cls_weight_norm_t.shape[1]

    # Split B across the two TensorCores (v7x megacore) whenever each block
    # stays a multiple of 8 sublanes; otherwise keep a single B block.
    nb = 2 if (B % 16 == 0) else 1
    bb = B // nb

    vmem_cap = _vmem_capacity_bytes()
    tile_budget = max(4 << 20, min(vmem_cap // 8, 16 << 20))
    tk = _pick_k_tile(K, nf_pad, k_tile, tile_budget)
    nk = K // tk

    imgs_bf = imgs.astype(jnp.bfloat16)
    img_flat = imgs_bf.reshape(B, K)

    # Explicit VMEM budget: double-buffered K stream + resident constants/outs,
    # capped at 75% of the per-core physical VMEM for this generation.
    est = (2 * (bb * tk + tk * nf_pad) * 2          # bf16 img / weight K tiles
           + 2 * nf_pad * nc_pad * 2                # bf16 normalized class W
           + 2 * bb * 128 * 4                       # labels block (padded)
           + 2 * (bb * nf_pad + bb * 128) * 4       # f32 outputs
           + (2 << 20))                             # Mosaic internal scratch
    vmem_limit = int(min(max(2 * est, 16 << 20), (vmem_cap * 3) // 4))

    kernel = functools.partial(fused_kernel, gamma=float(gamma), m=float(m),
                               num_classes=int(num_classes),
                               compute_loss=compute_loss)

    in_specs = [
        pl.BlockSpec((bb, tk), lambda b, k: (b, k)),          # imgs (flat)
        pl.BlockSpec((tk, nf_pad), lambda b, k: (k, 0)),      # backbone weight
    ]
    operands = [img_flat, backbone_weight_knf]
    out_shapes = [jax.ShapeDtypeStruct((B, nf_pad), jnp.float32)]
    out_specs = [pl.BlockSpec((bb, nf_pad), lambda b, k: (b, 0))]

    if compute_loss:
        labels2 = labels.astype(jnp.int32).reshape(B, 1)
        in_specs += [
            pl.BlockSpec((nf_pad, nc_pad), lambda b, k: (0, 0)),  # norm. W^T
            pl.BlockSpec((bb, 1), lambda b, k: (b, 0)),           # labels
        ]
        operands += [cls_weight_norm_t, labels2]
        out_shapes.append(jax.ShapeDtypeStruct((B, 1), jnp.float32))
        out_specs.append(pl.BlockSpec((bb, 1), lambda b, k: (b, 0)))

    outs = pl.pallas_call(
        kernel,
        out_shape=tuple(out_shapes),
        grid_spec=pltpu.PrefetchScalarGridSpec(
            num_scalar_prefetch=0,
            grid=(nb, nk),
            in_specs=in_specs,
            out_specs=tuple(out_specs)),
        compiler_params=pltpu.CompilerParams(
            dimension_semantics=("parallel", "arbitrary"),
            vmem_limit_bytes=vmem_limit),
    )(*operands)

    if not compute_loss:
        feat_pad = outs[0] if isinstance(outs, (tuple, list)) else outs
        return feat_pad[:, :num_features]

    feat_pad, lse = outs

    # Attention map (training path only, mirroring the PyTorch forward).
    img_full = imgs_bf.reshape(B, C, HW)
    attn = pl.pallas_call(
        attn_kernel,
        out_shape=jax.ShapeDtypeStruct((B, HW), jnp.float32),
        grid=(nb,),
        in_specs=[pl.BlockSpec((bb, C, HW), lambda b: (b, 0, 0))],
        out_specs=pl.BlockSpec((bb, HW), lambda b: (b, 0)),
        compiler_params=pltpu.CompilerParams(
            dimension_semantics=("parallel",)),
    )(img_full)

    loss = jnp.mean(lse)
    return feat_pad[:, :num_features], attn, loss


class RecogModelPallas:
    """Functional port of RecogModel.forward (synthetic backbone + CircleLoss)."""

    def __init__(self, num_classes, num_features, in_channels, spatial,
                 gamma=64.0, m=0.25, seed=0):
        self.gamma = float(gamma)
        self.m = float(m)
        self.num_classes = num_classes
        self.num_features = num_features
        self.nc_pad = _round_up(num_classes, 128)
        self.nf_pad = _round_up(num_features, 128)

        k1, k2 = jax.random.split(jax.random.PRNGKey(seed))
        din = in_channels * spatial * spatial

        # torch.normal(0, 0.01, (num_classes, num_features))
        w = 0.01 * jax.random.normal(k1, (num_classes, num_features),
                                     jnp.float32)
        self.cls_weight = w                          # reference layout (NC, NF)
        # Pre-normalize (F.normalize is a pure function of the weight), pad,
        # transpose to (NF_pad, NC_pad) and cast to bf16 ONCE here so the
        # per-forward logits matmul is a native bf16 MXU op.
        wn = w / jnp.maximum(jnp.linalg.norm(w, axis=-1, keepdims=True), 1e-12)
        self.cls_weight_norm_t = (
            jnp.zeros((self.nf_pad, self.nc_pad), jnp.float32)
            .at[:num_features, :num_classes].set(wn.T)
            .astype(jnp.bfloat16))

        # Synthetic backbone projection weight; transpose + NF padding + bf16
        # cast done ONCE here instead of per forward call.
        wb = (1.0 / math.sqrt(float(din))) * jax.random.normal(
            k2, (num_features, din), jnp.float32)
        self.backbone_weight = wb                    # (NF, K) reference layout
        wb_knf = jnp.zeros((din, self.nf_pad), jnp.float32
                           ).at[:, :num_features].set(wb.T)
        self.backbone_weight_knf = wb_knf.astype(jnp.bfloat16)  # (K, NF_pad)

    def __call__(self, imgs, labels=None, k_tile=None):
        # labels=None -> inference path: loss epilogue + class-weight DMA and
        # the attention kernel are skipped entirely at trace time.
        return recog_forward(
            imgs, labels, self.cls_weight_norm_t, self.backbone_weight_knf,
            self.gamma, self.m, self.num_classes, self.num_features, k_tile)


# ----------------------------------------------------------------------------
# Pure-JAX reference (mirrors the kernel's bf16 operand choices) for checks.
# ----------------------------------------------------------------------------
def _reference(imgs, labels, model):
    B, C, H, W = imgs.shape
    x = imgs.astype(jnp.bfloat16).reshape(B, -1)
    wb = model.backbone_weight.astype(jnp.bfloat16)            # (NF, K)
    feat = jnp.dot(x, wb.T, preferred_element_type=jnp.float32)
    feat = feat / jnp.maximum(
        jnp.linalg.norm(feat, axis=-1, keepdims=True), 1e-12)

    a = jnp.mean(imgs.astype(jnp.bfloat16).astype(jnp.float32)
                 .reshape(B, C, H * W), axis=1)
    attn = jax.nn.softmax(a, axis=-1)

    w = model.cls_weight
    wn = w / jnp.maximum(jnp.linalg.norm(w, axis=-1, keepdims=True), 1e-12)
    logits = jnp.dot(feat.astype(jnp.bfloat16), wn.T.astype(jnp.bfloat16),
                     preferred_element_type=jnp.float32)
    logits = jnp.clip(logits, -1.0, 1.0)
    nc = w.shape[0]
    p_mask = jnp.arange(nc)[None, :] == labels[:, None]
    alpha_p = jnp.maximum(-logits + 1.0 + model.m, 0.0)
    alpha_n = jnp.maximum(logits + model.m, 0.0)
    mod = jnp.where(p_mask,
                    alpha_p * (logits - (1.0 - model.m)) * model.gamma,
                    alpha_n * (logits - model.m) * model.gamma)
    s_p = jnp.sum(jnp.where(p_mask, mod, 0.0), axis=-1, keepdims=True)
    loss = jnp.mean(jax.scipy.special.logsumexp(mod - s_p, axis=1))
    return feat, attn, loss


if __name__ == "__main__":
    # B=16 exercises the 2-way "parallel" B split (megacore path) as well as
    # the multi-step K accumulation (k_tile=512 -> 2 K steps).
    B, C, H, W = 16, 4, 16, 16
    NUM_CLASSES, NUM_FEATURES = 16, 32

    key = jax.random.PRNGKey(0)
    k_img, k_lab = jax.random.split(key)
    imgs = jax.random.normal(k_img, (B, C, H, W), jnp.float32)
    labels = jax.random.randint(k_lab, (B,), 0, NUM_CLASSES, jnp.int32)

    model = RecogModelPallas(NUM_CLASSES, NUM_FEATURES, C, H,
                             gamma=64.0, m=0.25, seed=0)

    # Training path: features + attention + CircleLoss.
    features, attn, loss = model(imgs, labels, k_tile=512)
    jax.block_until_ready((features, attn, loss))

    # Inference path: features only (loss epilogue / attention kernel skipped).
    feat_only = model(imgs, k_tile=512)
    jax.block_until_ready(feat_only)

    ref_feat, ref_attn, ref_loss = _reference(imgs, labels, model)
    assert jnp.allclose(features, ref_feat, rtol=1e-3, atol=1e-3)
    assert jnp.allclose(feat_only, ref_feat, rtol=1e-3, atol=1e-3)
    assert jnp.allclose(attn, ref_attn, rtol=5e-3, atol=2e-3)
    assert jnp.allclose(loss, ref_loss, rtol=2e-3, atol=2e-3)

    print("KERNEL_OK")
</pallas_src>

<mosaic_0001>
module attributes {stable_mosaic.version = 11 : i64} {
  func.func @fused_kernel(%arg0: i32, %arg1: i32, %arg2: memref<8x512xbf16, #tpu.memory_space<vmem>>, %arg3: memref<512x128xbf16, #tpu.memory_space<vmem>>, %arg4: memref<128x128xbf16, #tpu.memory_space<vmem>>, %arg5: memref<8x1xi32, #tpu.memory_space<vmem>>, %arg6: memref<8x128xf32, #tpu.memory_space<vmem>>, %arg7: memref<8x1xf32, #tpu.memory_space<vmem>>) attributes {dimension_semantics = [#tpu.dimension_semantics<parallel>, #tpu.dimension_semantics<arbitrary>], iteration_bounds = array<i64: 2, 2>, scalar_prefetch = 0 : i64, scratch_operands = 0 : i64, tpu.core_type = #tpu.core_type<tc>, window_params = [{transform_indices = @transform_0, window_bounds = array<i64: 8, 512>}, {transform_indices = @transform_1, window_bounds = array<i64: 512, 128>}, {pipeline_mode = #tpu.pipeline_mode<synchronous>, transform_indices = @transform_2, window_bounds = array<i64: 128, 128>}, {transform_indices = @transform_3, window_bounds = array<i64: 8, 1>}, {transform_indices = @transform_4, window_bounds = array<i64: 8, 128>}, {transform_indices = @transform_5, window_bounds = array<i64: 8, 1>}]} {
    %c0_i32 = arith.constant 0 : i32
    %0 = arith.cmpi eq, %arg1, %c0_i32 : i32
    %1 = arith.extui %0 : i1 to i32
    %c0_i32_0 = arith.constant 0 : i32
    %2 = arith.cmpi ne, %1, %c0_i32_0 : i32
    scf.if %2 {
      %cst_9 = arith.constant 0.000000e+00 : f32
      %12 = vector.broadcast %cst_9 : f32 to vector<8x128xf32>
      %c0_10 = arith.constant 0 : index
      %c0_11 = arith.constant 0 : index
      %13 = vector.load %arg6[%c0_10, %c0_11] : memref<8x128xf32, #tpu.memory_space<vmem>>, vector<8x128xf32>
      tpu.vector_store %arg6[%c0_10, %c0_11], %12 {strides = array<i32>} : memref<8x128xf32, #tpu.memory_space<vmem>>, vector<8x128xf32>,
    } else {
    }
    %c0 = arith.constant 0 : index
    %c0_1 = arith.constant 0 : index
    %3 = vector.load %arg6[%c0, %c0_1] : memref<8x128xf32, #tpu.memory_space<vmem>>, vector<8x128xf32>
    %c0_2 = arith.constant 0 : index
    %c0_3 = arith.constant 0 : index
    %4 = vector.load %arg2[%c0_2, %c0_3] : memref<8x512xbf16, #tpu.memory_space<vmem>>, vector<8x512xbf16>
    %c0_4 = arith.constant 0 : index
    %c0_5 = arith.constant 0 : index
    %5 = vector.load %arg3[%c0_4, %c0_5] : memref<512x128xbf16, #tpu.memory_space<vmem>>, vector<512x128xbf16>
    %cst = arith.constant dense<0.000000e+00> : vector<8x128xf32>
    %6 = tpu.matmul %4, %5, %cst {dimension_numbers = #tpu.dot_dimension_numbers<[1], [0], [0], [1], [0, 0, 1, 1], [], []>} : vector<8x512xbf16>, vector<512x128xbf16>, vector<8x128xf32> -> vector<8x128xf32>
    %7 = arith.addf %3, %6 : vector<8x128xf32>
    %c0_6 = arith.constant 0 : index
    %c0_7 = arith.constant 0 : index
    %8 = vector.load %arg6[%c0_6, %c0_7] : memref<8x128xf32, #tpu.memory_space<vmem>>, vector<8x128xf32>
    tpu.vector_store %arg6[%c0_6, %c0_7], %7 {strides = array<i32>} : memref<8x128xf32, #tpu.memory_space<vmem>>, vector<8x128xf32>,
    %c1_i32 = arith.constant 1 : i32
    %9 = arith.cmpi eq, %arg1, %c1_i32 : i32
    %10 = arith.extui %9 : i1 to i32
    %c0_i32_8 = arith.constant 0 : i32
    %11 = arith.cmpi ne, %10, %c0_i32_8 : i32
    scf.if %11 {
      %c0_9 = arith.constant 0 : index
      %c0_10 = arith.constant 0 : index
      %12 = vector.load %arg6[%c0_9, %c0_10] : memref<8x128xf32, #tpu.memory_space<vmem>>, vector<8x128xf32>
      %13 = arith.mulf %12, %12 : vector<8x128xf32>
      %cst_11 = arith.constant dense<0.000000e+00> : vector<8xf32>
      %14 = vector.multi_reduction <add>, %13, %cst_11 [1] : vector<8x128xf32> to vector<8xf32>
      %15 = vector.shape_cast %14 : vector<8xf32> to vector<8x1xf32>
      %cst_12 = arith.constant 1.000000e-24 : f32
      %16 = vector.broadcast %cst_12 : f32 to vector<8x1xf32>
      %17 = arith.maximumf %15, %16 : vector<8x1xf32>
      %18 = math.rsqrt %17 : vector<8x1xf32>
      %19 = vector.broadcast %18 : vector<8x1xf32> to vector<8x128xf32>
      %20 = arith.mulf %12, %19 : vector<8x128xf32>
      %c0_13 = arith.constant 0 : index
      %c0_14 = arith.constant 0 : index
      %21 = vector.load %arg6[%c0_13, %c0_14] : memref<8x128xf32, #tpu.memory_space<vmem>>, vector<8x128xf32>
      tpu.vector_store %arg6[%c0_13, %c0_14], %20 {strides = array<i32>} : memref<8x128xf32, #tpu.memory_space<vmem>>, vector<8x128xf32>,
      %22 = arith.truncf %20 : vector<8x128xf32> to vector<8x128xbf16>
      %c0_15 = arith.constant 0 : index
      %c0_16 = arith.constant 0 : index
      %23 = vector.load %arg4[%c0_15, %c0_16] : memref<128x128xbf16, #tpu.memory_space<vmem>>, vector<128x128xbf16>
      %cst_17 = arith.constant dense<0.000000e+00> : vector<8x128xf32>
      %24 = tpu.matmul %22, %23, %cst_17 {dimension_numbers = #tpu.dot_dimension_numbers<[1], [0], [0], [1], [0, 0, 1, 1], [], []>} : vector<8x128xbf16>, vector<128x128xbf16>, vector<8x128xf32> -> vector<8x128xf32>
      %cst_18 = arith.constant -1.000000e+00 : f32
      %cst_19 = arith.constant 1.000000e+00 : f32
      %25 = vector.broadcast %cst_18 : f32 to vector<8x128xf32>
      %26 = arith.maximumf %25, %24 : vector<8x128xf32>
      %27 = vector.broadcast %cst_19 : f32 to vector<8x128xf32>
      %28 = arith.minimumf %27, %26 : vector<8x128xf32>
      %c0_20 = arith.constant 0 : index
      %c0_21 = arith.constant 0 : index
      %29 = vector.load %arg5[%c0_20, %c0_21] : memref<8x1xi32, #tpu.memory_space<vmem>>, vector<8x1xi32>
      %30 = tpu.iota {dimensions = array<i32: 1>} : vector<8x128xi32>
      %31 = vector.broadcast %29 : vector<8x1xi32> to vector<8x128xi32>
      %32 = arith.cmpi eq, %30, %31 : vector<8x128xi32>
      %c16_i32 = arith.constant 16 : i32
      %33 = vector.broadcast %c16_i32 : i32 to vector<8x128xi32>
      %34 = arith.cmpi slt, %30, %33 : vector<8x128xi32>
      %cst_22 = arith.constant 0.000000e+00 : f32
      %35 = vector.broadcast %cst_22 : f32 to vector<8x128xf32>
      %36 = arith.subf %35, %28 : vector<8x128xf32>
      %cst_23 = arith.constant 1.000000e+00 : f32
      %37 = vector.broadcast %cst_23 : f32 to vector<8x128xf32>
      %38 = arith.addf %36, %37 : vector<8x128xf32>
      %cst_24 = arith.constant 2.500000e-01 : f32
      %39 = vector.broadcast %cst_24 : f32 to vector<8x128xf32>
      %40 = arith.addf %38, %39 : vector<8x128xf32>
      %cst_25 = arith.constant 0.000000e+00 : f32
      %41 = vector.broadcast %cst_25 : f32 to vector<8x128xf32>
      %42 = arith.maximumf %40, %41 : vector<8x128xf32>
      %cst_26 = arith.constant 2.500000e-01 : f32
      %43 = vector.broadcast %cst_26 : f32 to vector<8x128xf32>
      %44 = arith.addf %28, %43 : vector<8x128xf32>
      %cst_27 = arith.constant 0.000000e+00 : f32
      %45 = vector.broadcast %cst_27 : f32 to vector<8x128xf32>
      %46 = arith.maximumf %44, %45 : vector<8x128xf32>
      %cst_28 = arith.constant 7.500000e-01 : f32
      %47 = vector.broadcast %cst_28 : f32 to vector<8x128xf32>
      %48 = arith.subf %28, %47 : vector<8x128xf32>
      %49 = arith.mulf %42, %48 : vector<8x128xf32>
      %cst_29 = arith.constant 6.400000e+01 : f32
      %50 = vector.broadcast %cst_29 : f32 to vector<8x128xf32>
      %51 = arith.mulf %49, %50 : vector<8x128xf32>
      %cst_30 = arith.constant 2.500000e-01 : f32
      %52 = vector.broadcast %cst_30 : f32 to vector<8x128xf32>
      %53 = arith.subf %28, %52 : vector<8x128xf32>
      %54 = arith.mulf %46, %53 : vector<8x128xf32>
      %cst_31 = arith.constant 6.400000e+01 : f32
      %55 = vector.broadcast %cst_31 : f32 to vector<8x128xf32>
      %56 = arith.mulf %54, %55 : vector<8x128xf32>
      %57 = arith.select %32, %51, %56 : vector<8x128xi1>, vector<8x128xf32>
      %cst_32 = arith.constant -1.000000e+30 : f32
      %58 = vector.broadcast %cst_32 : f32 to vector<8x128xf32>
      %59 = arith.select %34, %57, %58 : vector<8x128xi1>, vector<8x128xf32>
      %cst_33 = arith.constant 0.000000e+00 : f32
      %60 = vector.broadcast %cst_33 : f32 to vector<8x128xf32>
      %61 = arith.select %32, %59, %60 : vector<8x128xi1>, vector<8x128xf32>
      %cst_34 = arith.constant dense<0.000000e+00> : vector<8xf32>
      %62 = vector.multi_reduction <add>, %61, %cst_34 [1] : vector<8x128xf32> to vector<8xf32>
      %63 = vector.shape_cast %62 : vector<8xf32> to vector<8x1xf32>
      %64 = vector.broadcast %63 : vector<8x1xf32> to vector<8x128xf32>
      %65 = arith.subf %59, %64 : vector<8x128xf32>
      %cst_35 = arith.constant dense<0xFF800000> : vector<8xf32>
      %66 = vector.multi_reduction <maximumf>, %65, %cst_35 [1] : vector<8x128xf32> to vector<8xf32>
      %67 = vector.shape_cast %66 : vector<8xf32> to vector<8x1xf32>
      %68 = vector.broadcast %67 : vector<8x1xf32> to vector<8x128xf32>
      %69 = arith.subf %65, %68 : vector<8x128xf32>
      %70 = math.exp %69 : vector<8x128xf32>
      %cst_36 = arith.constant dense<0.000000e+00> : vector<8xf32>
      %71 = vector.multi_reduction <add>, %70, %cst_36 [1] : vector<8x128xf32> to vector<8xf32>
      %72 = vector.shape_cast %71 : vector<8xf32> to vector<8x1xf32>
      %73 = math.log %72 : vector<8x1xf32>
      %74 = arith.addf %67, %73 : vector<8x1xf32>
      %c0_37 = arith.constant 0 : index
      %c0_38 = arith.constant 0 : index
      %75 = vector.load %arg7[%c0_37, %c0_38] : memref<8x1xf32, #tpu.memory_space<vmem>>, vector<8x1xf32>
      tpu.vector_store %arg7[%c0_37, %c0_38], %74 {strides = array<i32>} : memref<8x1xf32, #tpu.memory_space<vmem>>, vector<8x1xf32>,
    } else {
    }
    return
  }
  func.func @transform_0(%arg0: i32, %arg1: i32) -> (i32, i32) {
    %c0_i32 = arith.constant 0 : i32
    return %arg0, %arg1 : i32, i32
  }
  func.func @transform_1(%arg0: i32, %arg1: i32) -> (i32, i32) {
    %c0_i32 = arith.constant 0 : i32
    %c0_i32_0 = arith.constant 0 : i32
    return %arg1, %c0_i32 : i32, i32
  }
  func.func @transform_2(%arg0: i32, %arg1: i32) -> (i32, i32) {
    %c0_i32 = arith.constant 0 : i32
    %c0_i32_0 = arith.constant 0 : i32
    %c0_i32_1 = arith.constant 0 : i32
    return %c0_i32, %c0_i32_0 : i32, i32
  }
  func.func @transform_3(%arg0: i32, %arg1: i32) -> (i32, i32) {
    %c0_i32 = arith.constant 0 : i32
    %c0_i32_0 = arith.constant 0 : i32
    return %arg0, %c0_i32 : i32, i32
  }
  func.func @transform_4(%arg0: i32, %arg1: i32) -> (i32, i32) {
    %c0_i32 = arith.constant 0 : i32
    %c0_i32_0 = arith.constant 0 : i32
    return %arg0, %c0_i32 : i32, i32
  }
  func.func @transform_5(%arg0: i32, %arg1: i32) -> (i32, i32) {
    %c0_i32 = arith.constant 0 : i32
    %c0_i32_0 = arith.constant 0 : i32
    return %arg0, %c0_i32 : i32, i32
  }
}

</mosaic_0001>

<bundles_post_ra>
// kernel: tpu_custom_call.1
= control target key start
LH: loop header
LB: loop body
LE: loop exit
PB: predicated region body
PF: predicated region fallthrough
CT: control target
= control target key end

     0   :  { %s2001_s0 = inlined_call_operand.hbm [shape: bf16[16,1024], index: 0, kind: input, shape index: {}]   ;;  %s2002_s1 = inlined_call_operand.hbm [shape: bf16[1024,128], index: 1, kind: input, shape index: {}]   ;;  %s2003_s2 = inlined_call_operand.hbm [shape: bf16[128,128], index: 2, kind: input, shape index: {}]   ;;  %s2004_s3 = inlined_call_operand.vmem [shape: s32[16,1], index: 3, kind: input, shape index: {}]   ;;  %s2005_s4 = inlined_call_operand.hbm [shape: f32[16,128], index: 4, kind: output, shape index: {0}]   ;;  %s2006_s5 = inlined_call_operand.vmem [shape: f32[16,1], index: 5, kind: output, shape index: {1}]  }
   0x1   :  { %2025 = sst [smem:[#allocation23_spill]] %s2001_s0 }
   0x2   :  { %2026 = sst [smem:[#allocation24_spill]] %s2003_s2 }
   0x3   :  { %2027 = sst [smem:[#allocation25_spill]] %s2004_s3 }
   0x4   :  { %2028 = sst [smem:[#allocation26_spill]] %s2005_s4 }
   0x5   :  { %2029 = sst [smem:[#allocation27_spill]] %s2006_s5 }
   0x6   :  { %11 = vsyncpa [#allocation3], 0 }
   0x7   :  { %13 = vsyncpa [#allocation3 + $0x1], 0 }
   0x8   :  { %14 = vsyncpa [#allocation6], 0 }
   0x9   :  { %16 = vsyncpa [#allocation6 + $0x1], 0 }
   0xa   :  { %17 = vsyncpa [#allocation4], 0 }
   0xb   :  { %19 = vsyncpa [#allocation4 + $0x1], 0  ;;  %s1653_s18 = smov 0   ;;  %s1655_s19 = smov 0  }
   0xc   :  { %s1657_s20 = smov 0   ;;  %s1659_s21 = smov 0  }
   0xd   :  { %s1661_s22 = smov 0   ;;  %s1663_s23 = smov 0  }
   0xe   :  { %s1665_s24 = smov 0   ;;  %s1667_s25 = smov 0  }
   0xf   :  { %s1669_s26 = smov 0   ;;  %s1671_s27 = smov 0  }
  0x10   :  { %s1673_s28 = smov 0   ;;  %s1675_s29 = smov 0  }
  0x11   :  { %s1677_s30 = smov 0   ;;  %s1679_s6 = smov 0  }
  0x12 LB: > { %2030 = sst [smem:[#allocation13_spill]] %s1559_s18  ;;  %s1722_s7 = sadd.s32 4294967295, %s1611_s6   ;;  %s1611_s6 = sphi %s1679_s6, %s25_s6   ;;  %s1607_s30 = sphi %s1677_s30, %s2075_s30   ;;  %s1603_s29 = sphi %s1675_s29, %s2086_s29   ;;  %s1599_s28 = sphi %s1673_s28, %s2073_s28   ;;  %s1595_s27 = sphi %s1671_s27, %s2085_s27   ;;  %s1591_s26 = sphi %s1669_s26, %s2084_s26   ;;  %s1587_s25 = sphi %s1667_s25, %s2083_s25   ;;  %s1583_s24 = sphi %s1665_s24, %s2082_s24   ;;  %s1579_s23 = sphi %s1663_s23, %s2081_s23   ;;  %s1575_s22 = sphi %s1661_s22, %s2080_s22   ;;  %s1571_s21 = sphi %s1659_s21, %s2079_s21   ;;  %s1567_s20 = sphi %s1657_s20, %s2078_s20   ;;  %s1563_s19 = sphi %s1655_s19, %s2077_s19   ;;  %s1559_s18 = sphi %s1653_s18, %s2072_s18  }
  0x13   : > { %2031 = sst [smem:[#allocation14_spill]] %s1563_s19  ;;  %s1033_s8 = sadd.s32 4294967294, %s1611_s6  }
  0x14   : > { %2032 = sst [smem:[#allocation15_spill]] %s1595_s27  ;;  %p2022_p0 = scmp.eq.s32.totalorder %s1722_s7, 0 }
  0x15   : > { %2033 = sst [smem:[#allocation16_spill]] %s1599_s28  ;;  %p85_p1 = scmp.ne.s32.totalorder %s1575_s22, %s1571_s21 }
  0x16   : > { %2034 = sst [smem:[#allocation17_spill]] %s1607_s30  ;;  %p155_p2 = scmp.ne.s32.totalorder %s1567_s20, %s1563_s19 }
  0x17   : > { %p156_p3 = scmp.eq.s32.totalorder %s1722_s7, 3  ;;  %p1732_p4 = por %p85_p1, %p2022_p0 }
  0x18   : > { %p161_p5 = scmp.ne.s32.totalorder %s1563_s19, %s1559_s18  ;;  %p162_p7 = scmp.eq.s32.totalorder %s1033_s8, 3 }
  0x19   : > { %s2035_s9 = scalar_select %p1732_p4, 1, 0 }
  0x1a   : > { %p1738_p6 = por %p156_p3, %p155_p2  ;;  %p1034_p8 = scmp.ge.s32.totalorder %s1611_s6, 1 }
  0x1b   : > { %2036 = sst [smem:[#allocation18_spill]] %s2035_s9  ;;  %p195_p9 = scmp.lt.s32.totalorder %s1611_s6, 5 }
  0x1c   : > { %s2037_s10 = scalar_select %p1738_p6, 1, 0 }
  0x1d   : > { %p1744_p10 = por %p162_p7, %p161_p5  ;;  %p1748_p11 = pnand %p1034_p8, %p195_p9 }
  0x1e   : > { %2038 = sst [smem:[#allocation19_spill]] %s2037_s10  ;;  %s1613_s13 = smov [#allocation7]  }
  0x1f   : > { %s2039_s11 = scalar_select %p1744_p10, 1, 0 }
  0x20   : > { %s207_s14 = sshll.u32 %s1613_s13, 4  ;;  %p1188_p12 = pneg %p1748_p11  ;;  %s208_s14 = int_to_ptr.vmem [resolvable:$true] %s207_s14 }
  0x21   : > { %2040 = sst [smem:[#allocation20_spill]] %s2039_s11  ;;  %s1388_s15 = scalar_lea.vmem %s208_s14, 1024 }
  0x22   : > { %p1189_p13 = pnand %p1188_p12, %p2022_p0  ;;  %p1389_p2 = scmp.ne.s32.totalorder %s208_s14, %s1388_s15 }
  0x23   : > { %p1396_p7 = scmp.lt.s32.totalorder %s208_s14, %s208_s14  ;;  %p1397_p6 = scmp.lt.s32.totalorder %s1388_s15, %s1388_s15 }
  0x24   : > { %p1379_p1 = pneg %p1189_p13 }
  0x25   : > { %p1398_p10 = por %p1397_p6, %p1396_p7 }
  0x26   : > { %p1391_p3 = pnand %p1389_p2, %p1379_p1 }
  0x28   : > { %p1392_p5 = pneg %p1391_p3 }
  0x2a   : > { %p1399_p8 = pnand %p1398_p10, %p1392_p5 }
  0x2c   : > { %1402 = shalt.err (!%p1399_p8)
}
  0x2d   : > { %s2010_s16 = smov 64   ;;  %s2011_s17 = smov 4  }
  0x2e   : > { %s2042_s2 = sld [smem:[#allocation24_spill]]  ;;  %s34_s13 = sadd.s32 1, %s1603_s29 }
  0x2f   : > { %s37_s15 = sadd.s32 1, %s1607_s30  ;;  %p35_p6 = scmp.ge.s32.totalorder %s34_s13, 2 }
  0x30   : > { %s46_s11 = sadd.s32 1, %s1591_s26  ;;  %p53_p9 = scmp.ne.s32.totalorder %s1591_s26, %s1587_s25 }
  0x31   : > { %p54_p10 = scmp.eq.s32.totalorder %s1611_s6, 0  ;;  %s2088_s13 = smov (%p35_p6, %s34_s13), 0 }
  0x32   : > { %2043 = sst [smem:[#allocation21_spill]] %s2088_s13  ;;  %s2090_s15 = smov (!%p35_p6, %s37_s15), %s1607_s30 }
  0x33   : > { %s42_s18 = ssub.s32 %s1603_s29, %s2088_s13  ;;  %p1775_p12 = por %p54_p10, %p53_p9 }
  0x34   : > { %1191 = dma.hbm_to_vmem [thread:$0]  (!%p1189_p13), %s2042_s2, 1024, %s208_s14, [#allocation6], %s2010_s16, %s2010_s16, %s2011_s17  }
  0x35   : > { %p39_p13 = scmp.ge.s32.totalorder %s2090_s15, 2  ;;  %p59_p1 = scmp.ne.s32.totalorder %s1587_s25, %s1583_s24 }
  0x36   : > { %p70_p2 = scmp.eq.s32.totalorder %s42_s18, 0  ;;  %s72_s21 = sadd.s32 1, %s1579_s23 }
  0x37   : > { %s2092_s15 = smov (%p39_p13, %s2090_s15), 0  ;;  %p1786_p3 = por %p2022_p0, %p59_p1 }
  0x38   : > { %2045 = sst [smem:[#allocation22_spill]] %s2092_s15  ;;  %p79_p5 = scmp.ne.s32.totalorder %s1579_s23, %s1575_s22 }
  0x39   : > { %s41_s16 = ssub.s32 %s1607_s30, %s2092_s15  ;;  %s145_s17 = sadd.s32 1, %s1567_s20 }
  0x3a   : > { %s43_s2 = sor.u32 %s42_s18, %s41_s16  ;;  %p1797_p7 = por %p79_p5, %p54_p10 }
  0x3b   : > { %p44_p8 = scmp.eq.s32.totalorder %s43_s2, 0  ;;  %p143_p6 = scmp.eq.s32.totalorder %s41_s16, 0 }
  0x3c   : > { %s1802_s13 = scalar_select %p70_p2, %s1579_s23, %s72_s21  }
  0x3d   : > { %s1805_s4 = scalar_select %p44_p8, %s1591_s26, %s46_s11  }
  0x3e   : > { %s1808_s10 = scalar_select %p143_p6, %s1567_s20, %s145_s17  }
  0x3f   : > { %p1204_p9 = scmp.lt.s32.totalorder %s1611_s6, 4  ;;  %s221_s15 = sand.u32 1, %s1591_s26  }
  0x40   : > { %s1037_s27 = sshll.u32 %s221_s15, 4  ;;  %s1038_s18 = sshll.u32 %s1603_s29, 2 }
  0x41   : > { %s1039_s5 = sshll.u32 %s1607_s30, 3  ;;  %s225_s3 = scalar_lea.vmem [#allocation2], %s1037_s27 }
  0x42   : > { %s235_s28 = sshll.u32 %s225_s3, 4  ;;  %s231_s19 = sadd.s32 %s1039_s5, %s1038_s18  ;;  %s236_s28 = int_to_ptr.vmem [resolvable:$true] %s235_s28 }
  0x43   : > { %s1040_s9 = sshll.u32 %s231_s19, 6  ;;  %p1816_p10 = pnand %p1204_p9, %p1775_p12 }
  0x44   : > { %s2049_s0 = sld [smem:[#allocation23_spill]]  ;;  %p1825_p13 = pnand %p1204_p9, %p1797_p7 }
  0x45   : > { %s242_s27 = sand.u32 1, %s1611_s6   ;;  %s222_s3 = scalar_lea.sflag [#allocation3], %s221_s15 }
  0x46   : > { %p1405_p1 = pneg %p1816_p10  ;;  %s1416_s5 = scalar_lea.vmem %s236_s28, 256 }
  0x47   : > { %p1417_p2 = scmp.ne.s32.totalorder %s236_s28, %s1416_s5  ;;  %s1616_s19 = smov [#allocation2]  }
  0x48   : > { %s1421_s14 = sshll.u32 %s1616_s19, 4  ;;  %s1422_s14 = int_to_ptr.vmem [resolvable:$false] %s1421_s14 }
  0x49   : > { %p1419_p12 = pnand %p1417_p2, %p1405_p1  ;;  %s1423_s18 = scalar_lea.vmem %s1422_s14, 512 }
  0x4a   : > { %s233_s17 = scalar_lea.hbm %s2049_s0, %s1040_s9  ;;  %p1424_p8 = scmp.lt.s32.totalorder %s236_s28, %s1422_s14 }
  0x4b   : > { %p1420_p5 = pneg %p1419_p12  ;;  %p1425_p6 = scmp.lt.s32.totalorder %s1423_s18, %s1416_s5 }
  0x4d   : > { %p1426_p0 = por %p1425_p6, %p1424_p8 }
  0x4f   : > { %p1427_p4 = pnand %p1426_p0, %p1420_p5 }
  0x51   : > { %1430 = shalt.err (!%p1427_p4)
}
  0x52   : > { %1195 = dma.hbm_to_vmem [thread:$0]  (!%p1816_p10), %s233_s17, 256, %s236_s28, %s222_s3  }
  0x53   : > { %s244_s9 = sand.u32 1, %s1579_s23   ;;  %s1104_s15 = sshll.u32 %s1603_s29, 12 }
  0x54   : > { %s1041_s24 = sshll.u32 %s244_s9, 8  ;;  %s252_s19 = scalar_lea.hbm %s2002_s1, %s1104_s15 }
  0x55   : > { %s246_s0 = scalar_lea.vmem [#allocation5], %s1041_s24  ;;  %s243_s5 = scalar_lea.sflag [#allocation6], %s242_s27 }
  0x56   : > { %s253_s30 = sshll.u32 %s246_s0, 4  ;;  %p1433_p0 = pneg %p1825_p13  ;;  %s254_s30 = int_to_ptr.vmem [resolvable:$true] %s253_s30 }
  0x57   : > { %s1444_s14 = scalar_lea.vmem %s254_s30, 4096  ;;  %s1617_s2 = smov [#allocation5]  }
  0x58   : > { %p1445_p4 = scmp.ne.s32.totalorder %s254_s30, %s1444_s14  ;;  %s1449_s18 = sshll.u32 %s1617_s2, 4  ;;  %s1450_s18 = int_to_ptr.vmem [resolvable:$false] %s1449_s18 }
  0x59   : > { %s1451_s28 = scalar_lea.vmem %s1450_s18, 8192  ;;  %p1452_p10 = scmp.lt.s32.totalorder %s254_s30, %s1450_s18 }
  0x5a   : > { %p1447_p7 = pnand %p1445_p4, %p1433_p0  ;;  %p1453_p1 = scmp.lt.s32.totalorder %s1451_s28, %s1444_s14 }
  0x5c   : > { %p1448_p9 = pneg %p1447_p7  ;;  %p1454_p2 = por %p1453_p1, %p1452_p10 }
  0x5e   : > { %p1455_p12 = pnand %p1454_p2, %p1448_p9 }
  0x60   : > { %1458 = shalt.err (!%p1455_p12)
}
  0x61   : > { %s2051_s0 = smov 4   ;;  %s2052_s17 = smov 64  }
  0x62   : > { %1198 = dma.hbm_to_vmem [thread:$0]  (!%p1825_p13), %s252_s19, 4096, %s254_s30, %s243_s5, %s2052_s17, %s2052_s17, %s2051_s0  }
  0x63   : > { %272 = sbr.rel (%p1748_p11) target bundleno = 1230 (0x4ce), region = 36  ;;  %s274_s27 = sand.u32 (!%p1748_p11), 1, %s1587_s25  }
  0x64   : > { %s1849_s3 = sshll.u32 (!%p1748_p11), %s274_s27, 4  ;;  %s275_s9 = scalar_lea.sflag (!%p1748_p11), [#allocation3], %s274_s27 }
  0x65   : > { %s278_s15 = scalar_lea.vmem (!%p1748_p11), [#allocation2], %s1849_s3 }
  0x68   : > { %1542 = dma.done.wait (%p1786_p3), %s275_s9, 256  }
  0x69   : > { %1544 = vsyncadd (%p1786_p3), %s275_s9, 4294967040  ;;  %s2053_s21 = sld [smem:[#allocation18_spill]]  ;;  %s283_s30 = sand.u32 1, %s1722_s7  }
  0x6a   : > { %s285_s24 = sand.u32 1, %s1575_s22   ;;  %s284_s16 = scalar_lea.sflag [#allocation6], %s283_s30 }
  0x6b   : > { %s1046_s12 = sshll.u32 %s285_s24, 8 }
  0x6c   : > { %s1858_s11 = scalar_lea.vmem [#allocation5], %s1046_s12 }
  0x6f   : > { %p2054_p11 = scmp.ne.s32.totalorder %s2053_s21, 0 }
  0x71   : > { %1546 = dma.done.wait (%p2054_p11), %s284_s16, 4096  }
  0x72   : > { %1548 = vsyncadd (%p2054_p11), %s284_s16, 4294963200  ;;  %p2055_p13 = scmp.eq.s32.totalorder %s1722_s7, 0 }
  0x74   : > { %1550 = dma.done.wait (%p2055_p13), [#allocation6], 1024   ;;  %p2056_p5 = pmov %p2055_p13 }
  0x75   : > { %s2057_s8 = sld [smem:[#allocation14_spill]] }
  0x76   : > { %1552 = vsyncadd (%p2056_p5), [#allocation6], 4294966272  ;;  %s2058_s19 = sld [smem:[#allocation16_spill]] }
  0x77   : > { %s2059_s0 = sld [smem:[#allocation25_spill]] }
  0x78   : > { %s2060_s21 = sld [smem:[#allocation27_spill]] }
  0x79   : > { %s2061_s24 = sld [smem:[#allocation15_spill]] }
  0x7b   : > { %s322_s5 = sand.u32 1, %s2057_s8  }
  0x7c   : > { %p333_p3 = scmp.lt.s32.totalorder %s2058_s19, 1  ;;  %s1048_s14 = sshll.u32 %s322_s5, 3 }
  0x7d   : > { %s1883_s30 = scalar_lea.vmem [#allocation8], %s1048_s14 }
  0x7e   : > { %s2094_s19 = smov (!%p333_p3, %s2058_s19), 1 }
  0x7f   : > { %s1049_s2 = sshll.u32 %s2094_s19, 3  ;;  %p1051_p8 = scmp.ne.s32.totalorder %s2061_s24, 0 }
  0x80   : > { %s1876_s17 = scalar_lea.vmem %s2059_s0, %s1049_s2  ;;  %s1881_s7 = scalar_lea.vmem %s2060_s21, %s1049_s2 }
  0x81   : > { %345 = sbr.rel (%p1051_p8) target bundleno = 136 (0x88), region = 52 }
  0x86   : > { %v1618_v0 = vmov 0.0  }
  0x87   : > { %346 = vst [vmem:[%s1883_s30] sm:$0xff] %v1618_v0 }
  0x88 PF: > { %v1326_v1 = vld [vmem:[%s1858_s11 + $0x78] sm:$0xff]   ;;  %v1330_v5 = vld [vmem:[%s1858_s11 + $0x70] sm:$0xff]   ;;  %v1334_v9 = vld [vmem:[%s1858_s11 + $0x68] sm:$0xff]   ;;  %s2062_s3 = sld [smem:[#allocation15_spill]] }
  0x89   : > { %v1327_v2 = vld [vmem:[%s1858_s11 + $0xf8] sm:$0xff]   ;;  %1105 = vmatprep.subr.bf16.mxu0 %v1326_v1  ;;  %v1331_v6 = vld [vmem:[%s1858_s11 + $0xf0] sm:$0xff]   ;;  %v1335_v10 = vld [vmem:[%s1858_s11 + $0xe8] sm:$0xff]  }
  0x8a   : > { %v1328_v3 = vld [vmem:[%s1858_s11 + $0x38] sm:$0xff]   ;;  %1127 = vmatprep.subr.bf16.mxu1 %v1327_v2  ;;  %v1332_v7 = vld [vmem:[%s1858_s11 + $0x30] sm:$0xff]   ;;  %v1336_v11 = vld [vmem:[%s1858_s11 + $0x28] sm:$0xff]  }
  0x8b   : > { %v1329_v4 = vld [vmem:[%s1858_s11 + $0xb8] sm:$0xff]   ;;  %1106 = vmatpush3.bf16.msra.mxu0 %v1328_v3  ;;  %v1333_v8 = vld [vmem:[%s1858_s11 + $0xb0] sm:$0xff]   ;;  %v1337_v12 = vld [vmem:[%s1858_s11 + $0xa8] sm:$0xff]  }
  0x8c   : > { %1128 = vmatpush3.bf16.msra.mxu1 %v1329_v4  ;;  %1107 = vmatprep.subr.bf16.mxu0 %v1330_v5  ;;  %v1338_v13 = vld [vmem:[%s1858_s11 + $0x60] sm:$0xff]   ;;  %v1342_v17 = vld [vmem:[%s1858_s11 + $0x58] sm:$0xff]   ;;  %v1346_v21 = vld [vmem:[%s1858_s11 + $0x50] sm:$0xff]  }
  0x8d   : > { %1129 = vmatprep.subr.bf16.mxu1 %v1331_v6  ;;  %v1339_v14 = vld [vmem:[%s1858_s11 + $0xe0] sm:$0xff]   ;;  %v1343_v18 = vld [vmem:[%s1858_s11 + $0xd8] sm:$0xff]   ;;  %v1347_v22 = vld [vmem:[%s1858_s11 + $0xd0] sm:$0xff]  }
  0x8e   : > { %v1340_v15 = vld [vmem:[%s1858_s11 + $0x20] sm:$0xff]   ;;  %v1344_v19 = vld [vmem:[%s1858_s11 + $0x18] sm:$0xff]   ;;  %v1348_v23 = vld [vmem:[%s1858_s11 + $0x10] sm:$0xff]   ;;  %p1088_p6 = scmp.ne.s32.totalorder %s2062_s3, 1 }
  0x8f   : > { %1108 = vmatpush3.bf16.msra.mxu0 %v1332_v7  ;;  %v1341_v16 = vld [vmem:[%s1858_s11 + $0xa0] sm:$0xff]   ;;  %v1345_v20 = vld [vmem:[%s1858_s11 + $0x98] sm:$0xff]   ;;  %v1349_v24 = vld [vmem:[%s1858_s11 + $0x90] sm:$0xff]  }
  0x90   : > { %1130 = vmatpush3.bf16.msra.mxu1 %v1333_v8  ;;  %1109 = vmatprep.subr.bf16.mxu0 %v1334_v9  ;;  %v1350_v25 = vld [vmem:[%s1858_s11 + $0x48] sm:$0xff]   ;;  %v1354_v29 = vld [vmem:[%s1858_s11 + $0x40] sm:$0xff]  }
  0x91   : > { %1131 = vmatprep.subr.bf16.mxu1 %v1335_v10  ;;  %v1351_v26 = vld [vmem:[%s1858_s11 + $0xc8] sm:$0xff]   ;;  %v1355_v30 = vld [vmem:[%s1858_s11 + $0xc0] sm:$0xff]  }
  0x92   : > { %v1352_v27 = vld [vmem:[%s1858_s11 + $0x8] sm:$0xff]   ;;  %v1356_v31 = vld [vmem:[%s1858_s11] sm:$0xff]  }
  0x93   : > { %1110 = vmatpush3.bf16.msra.mxu0 %v1336_v11  ;;  %v1353_v28 = vld [vmem:[%s1858_s11 + $0x88] sm:$0xff]   ;;  %v1357_v32 = vld [vmem:[%s1858_s11 + $0x80] sm:$0xff]  }
  0x94   : > { %1132 = vmatpush3.bf16.msra.mxu1 %v1337_v12  ;;  %1111 = vmatprep.subr.bf16.mxu0 %v1338_v13  ;;  %v348_v33 = vld [vmem:[%s278_s15] sm:$0xff]  ;;  %v349_v34 = vld [vmem:[%s278_s15 + $0x8] sm:$0xff] }
  0x95   : > { %1133 = vmatprep.subr.bf16.mxu1 %v1339_v14  ;;  %v1052_v35 = vcombine.low %v348_v33, %v348_v33  ;;  %v1053_v36 = vcombine.high %v348_v33, %v348_v33  ;;  %v1054_v37 = vcombine.low %v349_v34, %v349_v34  ;;  %v1055_v38 = vcombine.high %v349_v34, %v349_v34  ;;  %v347_v45 = vld [vmem:[%s1883_s30] sm:$0xff] }
  0x97   : > { %1112 = vmatpush3.bf16.msra.mxu0 %v1340_v15  ;;  %652 = vmatprep.mubr.bf16.mxu0 %v1053_v36 }
  0x98   : > { %1134 = vmatpush3.bf16.msra.mxu1 %v1341_v16  ;;  %1113 = vmatprep.subr.bf16.mxu0 %v1342_v17 }
  0x99   : > { %1135 = vmatprep.subr.bf16.mxu1 %v1343_v18  ;;  %692 = vmatprep.mubr.bf16.mxu1 %v1055_v38 }
  0x9b   : > { %1114 = vmatpush3.bf16.msra.mxu0 %v1344_v19 }
  0x9c   : > { %1136 = vmatpush3.bf16.msra.mxu1 %v1345_v20  ;;  %1115 = vmatprep.subr.bf16.mxu0 %v1346_v21 }
  0x9d   : > { %1137 = vmatprep.subr.bf16.mxu1 %v1347_v22 }
  0x9f   : > { %1116 = vmatpush3.bf16.msra.mxu0 %v1348_v23 }
  0xa0   : > { %1138 = vmatpush3.bf16.msra.mxu1 %v1349_v24  ;;  %1117 = vmatprep.subr.bf16.mxu0 %v1350_v25 }
  0xa1   : > { %1139 = vmatprep.subr.bf16.mxu1 %v1351_v26 }
  0xa3   : > { %1118 = vmatpush3.bf16.msra.mxu0 %v1352_v27 }
  0xa4   : > { %1140 = vmatpush3.bf16.msra.mxu1 %v1353_v28  ;;  %1119 = vmatprep.subr.bf16.mxu0 %v1354_v29 }
  0xa5   : > { %1141 = vmatprep.subr.bf16.mxu1 %v1355_v30 }
  0xa7   : > { %1120 = vmatpush3.bf16.msra.mxu0 %v1356_v31 }
  0xa8   : > { %1142 = vmatpush3.bf16.msra.mxu1 %v1357_v32 }
  0xaa   : > { %653 = vmatmul.mubr.bf16.vlgmr.msra.gmra.mxu0 %v1052_v35 }
  0xab   : > { %693 = vmatmul.mubr.bf16.vlgmr.msra.gmra.mxu1 %v1054_v37 }
 0x16a   : > { %v1121_v39 = vpop.f32.mrf.mxu0 }
 0x16b   : > { %v1143_v40 = vpop.f32.mrf.mxu1 }
 0x16c   : > { %v1122_v41 = vpop.f32.mrf.mxu0 }
 0x16d   : > { %v1144_v42 = vpop.f32.mrf.mxu1  ;;  %v1123_v43 = vadd.f32 %v1122_v41, %v1121_v39 }
 0x16e   : > { %v1145_v44 = vadd.f32 %v1144_v42, %v1143_v40  ;;  %v1124_v46 = vpop.f32.mrf.mxu0 }
 0x16f   : > { %v1146_v47 = vpop.f32.mrf.mxu1 }
 0x170   : > { %v695_v48 = vadd.f32 %v1145_v44, %v1123_v43  ;;  %v1125_v49 = vpop.f32.mrf.mxu0  ;;  %705 = sbr.rel (%p1088_p6) target bundleno = 1203 (0x4b3), region = 56 }
 0x171   : > { %v1147_v50 = vpop.f32.mrf.mxu1 }
 0x172   : > { %v700_v51 = vadd.f32 %v695_v48, %v347_v45 }
 0x174   : > { %701 = vst [vmem:[%s1883_s30] sm:$0xff] %v700_v51 }
 0x175   : > { %v1619_v54 = vmov 0.0   ;;  %v1363_v55 = vld [vmem:[#allocation7 + $0x38] sm:$0xff]   ;;  %v1364_v56 = vld [vmem:[#allocation7 + $0x30] sm:$0xff]   ;;  %v1365_v57 = vld [vmem:[#allocation7 + $0x28] sm:$0xff]   ;;  %vm1620_vm0 = vmmov 0   ;;  %v1621_v0 = vmov 0   ;;  %v822_v12 = vlaneseq }
 0x176   : > { %1158 = vmatprep.subr.bf16.mxu0 %v1619_v54  ;;  %v1366_v58 = vld [vmem:[#allocation7 + $0x20] sm:$0xff]   ;;  %v1367_v59 = vld [vmem:[#allocation7 + $0x18] sm:$0xff]   ;;  %1174 = vmatprep.mubr.msk.bf16.mxu0 %vm1620_vm0, %v1619_v54  ;;  %v1368_v60 = vld [vmem:[#allocation7 + $0x10] sm:$0xff]   ;;  %vm857_vm3 = vcmask 7168  }
 0x177   : > { %1159 = vmatpush3.bf16.msra.mxu0 %v1363_v55  ;;  %v1369_v61 = vld [vmem:[#allocation7 + $0x8] sm:$0xff]   ;;  %v1370_v62 = vld [vmem:[#allocation7] sm:$0xff]   ;;  %1362 = vset.pattern.permute.xlu0 %v1621_v0  ;;  %v823_v18 = vand.u32 127, %v822_v12 }
 0x178   : > { %1160 = vmatprep.subr.bf16.mxu0 %v1619_v54  ;;  %v821_v63 = vld [vmem:[%s1876_s17] sm:$0xff] }
 0x179   : > { %vm828_vm2 = vcmp.lt.s32.totalorder %v823_v18, 16 }
 0x17b   : > { %v706_v52 = vld [vmem:[%s1883_s30] sm:$0xff]  ;;  %1161 = vmatpush3.bf16.msra.mxu0 %v1364_v56 }
 0x17c   : > { %v707_v53 = vmul.f32 %v706_v52, %v706_v52  ;;  %1162 = vmatprep.subr.bf16.mxu0 %v1619_v54 }
 0x17e   : > { %708 = vadd.xlane.f32.xlu0 %v707_v53 }
 0x17f   : > { %1163 = vmatpush3.bf16.msra.mxu0 %v1365_v57 }
 0x180   : > { %1164 = vmatprep.subr.bf16.mxu0 %v1619_v54 }
 0x183   : > { %1165 = vmatpush3.bf16.msra.mxu0 %v1366_v58 }
 0x184   : > { %1166 = vmatprep.subr.bf16.mxu0 %v1619_v54 }
 0x187   : > { %1167 = vmatpush3.bf16.msra.mxu0 %v1367_v59 }
 0x188   : > { %1168 = vmatprep.subr.bf16.mxu0 %v1619_v54 }
 0x18b   : > { %1169 = vmatpush3.bf16.msra.mxu0 %v1368_v60 }
 0x18c   : > { %1170 = vmatprep.subr.bf16.mxu0 %v1619_v54 }
 0x18f   : > { %1171 = vmatpush3.bf16.msra.mxu0 %v1369_v61 }
 0x190   : > { %1172 = vmatprep.subr.bf16.mxu0 %v1619_v54 }
 0x193   : > { %1173 = vmatpush3.bf16.msra.mxu0 %v1370_v62 }
 0x194   : > { %825 = vperm.xlu0 %1362, %v821_v63  }
 0x207   : > { %v709_v1 = vpop.xlane.xlu0 %708 }
 0x208   : > { %v710_v2 = vmax.f32 %v709_v1, 1e-24 }
 0x20a   : > { %1371 = vrsqrt.f32 %v710_v2 }
 0x20f   : > { %v826_v20 = vpop.permute.xlu0 %825 }
 0x210   : > { %vm827_vm1 = vcmp.eq.s32.totalorder %v823_v18, %v826_v20 }
 0x217   : > { %v1372_v3 = vpop.eup %1371 }
 0x218   : > { %v712_v4 = vmul.f32 %v1372_v3, %v706_v52 }
 0x21a   : > { %713 = vst [vmem:[%s1883_s30] sm:$0xff] %v712_v4  ;;  %v714_v5 = vpack.c.bf16 %v712_v4, %v712_v4 }
 0x21c   : > { %1175 = vmatmul.mubr.bf16.vlgmr.msra.gmra.mxu0 %v714_v5 }
 0x2dc   : > { %v813_v6 = vpop.f32.mrf.mxu0 }
 0x2dd   : > { %v1097_v7 = vclamps-f32 %v813_v6, 1.0 }
 0x2de   : > { %v1176_v8 = vpop.f32.mrf.mxu0 }
 0x2df   : > { %v829_v9 = vsub.f32 0.0, %v1097_v7  ;;  %v833_v10 = vadd.f32 0.25, %v1097_v7  ;;  %v1099_v16 = vadd.f32 -0.25, %v1097_v7  ;;  %v1098_v19 = vadd.f32 -0.75, %v1097_v7 }
 0x2e0   : > { %v816_v11 = vpop.f32.mrf.mxu0 }
 0x2e1   : > { %v830_v13 = vadd.f32 1.0, %v829_v9  ;;  %v834_v14 = vmax.f32 %v833_v10, 0.0 }
 0x2e2   : > { %v1177_v15 = vpop.f32.mrf.mxu0 }
 0x2e3   : > { %v831_v17 = vadd.f32 0.25, %v830_v13  ;;  %v839_v22 = vmul.f32 %v1099_v16, %v834_v14 }
 0x2e5   : > { %v832_v21 = vmax.f32 %v831_v17, 0.0  ;;  %v840_v25 = vmul.f32 64.0, %v839_v22 }
 0x2e7   : > { %v836_v23 = vmul.f32 %v1098_v19, %v832_v21 }
 0x2e9   : > { %v837_v24 = vmul.f32 64.0, %v836_v23 }
 0x2eb   : > { %v841_v26 = vsel %vm827_vm1, %v837_v24, %v840_v25 }
 0x2ec   : > { %v842_v27 = vsel %vm828_vm2, %v841_v26, -1e+30 }
 0x2ed   : > { %v843_v28 = vsel %vm827_vm1, %v842_v27, 0.0 }
 0x2ee   : > { %844 = vadd.xlane.f32.xlu1 %v843_v28 }
 0x377   : > { %v845_v29 = vpop.xlane.xlu1 %844 }
 0x378   : > { %v846_v30 = vsub.f32 %v842_v27, %v845_v29 }
 0x37a   : > { %847 = vmax.xlane.f32.xlu1 %v846_v30 }
 0x403   : > { %v848_v31 = vpop.xlane.xlu1 %847 }
 0x404   : > { %v849_v32 = vsub.f32 %v846_v30, %v848_v31 }
 0x406   : > { %v850_v33 = vmul.f32 1.442695, %v849_v32 }
 0x408   : > { %1373 = vpow2.f32 %v850_v33 }
 0x415   : > { %v1374_v34 = vpop.eup %1373 }
 0x416   : > { %852 = vadd.xlane.f32.xlu1 %v1374_v34 }
 0x49f   : > { %v853_v35 = vpop.xlane.xlu1 %852 }
 0x4a0   : > { %1375 = vlog2.f32 %v853_v35 }
 0x4ad   : > { %v1376_v36 = vpop.eup %1375 }
 0x4ae   : > { %v855_v37 = vmul.f32 0.6931472, %v1376_v36 }
 0x4b0   : > { %v856_v38 = vadd.f32 %v855_v37, %v848_v31 }
 0x4b2   : > { %858 = vst.msk [vmem:[%s1881_s7] sm:$0xff] %vm857_vm3, %v856_v38 }
 0x4b3 PF: > { %s2063_s15 = sld [smem:[#allocation16_spill]]  ;;  %s877_s18 = sshll.u32 %s1883_s30, 4  ;;  %s878_s18 = int_to_ptr.vmem [resolvable:$true] %s877_s18 }
 0x4b4   : > { %s2065_s16 = sld [smem:[#allocation19_spill]]  ;;  %s860_s28 = scalar_lea.sflag [#allocation4], %s322_s5 }
 0x4b5   : > { %s2066_s14 = sld [smem:[#allocation26_spill]]  ;;  %s1459_s0 = scalar_lea.vmem %s878_s18, 128 }
 0x4b6   : > { %p1460_p0 = scmp.ne.s32.totalorder %s878_s18, %s1459_s0  ;;  %s1622_s17 = smov [#allocation8]  }
 0x4b7   : > { %s1463_s27 = sshll.u32 %s1622_s17, 4  ;;  %s1464_s27 = int_to_ptr.vmem [resolvable:$false] %s1463_s27 }
 0x4b8   : > { %s1465_s9 = scalar_lea.vmem %s1464_s27, 256  ;;  %p1466_p10 = scmp.lt.s32.totalorder %s878_s18, %s1464_s27 }
 0x4b9   : > { %s1101_s11 = sshll.u32 %s2063_s15, 7  ;;  %p1467_p1 = scmp.lt.s32.totalorder %s1465_s9, %s1459_s0 }
 0x4ba   : > { %p2067_p4 = scmp.ne.s32.totalorder %s2065_s16, 0 }
 0x4bb   : > { %s875_s2 = scalar_lea.hbm %s2066_s14, %s1101_s11  ;;  %p1468_p2 = por %p1467_p1, %p1466_p10 }
 0x4bc   : > { %p1461_p7 = pnand %p1460_p0, %p2067_p4 }
 0x4be   : > { %p1462_p9 = pneg %p1461_p7 }
 0x4c0   : > { %p1469_p12 = pnand %p1468_p2, %p1462_p9 }
 0x4c2   : > { %1472 = shalt.err (!%p1469_p12)
}
 0x4c3   : > { %s1473_s21 = scalar_lea.hbm %s875_s2, 128  ;;  %s1477_s30 = scalar_lea.hbm %s2066_s14, 256 }
 0x4c4   : > { %p1474_p11 = scmp.ne.s32.totalorder %s875_s2, %s1473_s21  ;;  %p1478_p3 = scmp.lt.s32.totalorder %s875_s2, %s2066_s14 }
 0x4c5   : > { %p1479_p8 = scmp.lt.s32.totalorder %s1477_s30, %s1473_s21 }
 0x4c6   : > { %p1475_p13 = pnand %p1474_p11, %p2067_p4 }
 0x4c7   : > { %p1480_p6 = por %p1479_p8, %p1478_p3 }
 0x4c8   : > { %p1476_p5 = pneg %p1475_p13 }
 0x4ca   : > { %p1481_p0 = pnand %p1480_p6, %p1476_p5 }
 0x4cc   : > { %1484 = shalt.err (!%p1481_p0)
}
 0x4cd   : > { %1186 = dma.vmem_to_hbm [thread:$0]  (%p2067_p4), %s878_s18, 128, %s875_s2, %s860_s28  }
 0x4ce PF: > { %s2068_s15 = sld [smem:[#allocation13_spill]]  ;;  %p1206_p7 = scmp.ge.s32.totalorder %s1611_s6, 2 }
 0x4cf   : > { %s2069_s12 = sld [smem:[#allocation20_spill]] }
 0x4d4   : > { %s892_s11 = sand.u32 1, %s2068_s15  }
 0x4d5   : > { %p2070_p9 = scmp.ne.s32.totalorder %s2069_s12, 0  ;;  %s893_s8 = scalar_lea.sflag [#allocation4], %s892_s11 }
 0x4d7   : > { %p1200_p10 = pnand %p1206_p7, %p2070_p9 }
 0x4d9   : > { %p1201_p1 = pneg %p1200_p10 }
 0x4db   : > { %1554 = dma.done.wait (%p1201_p1), %s893_s8, 128  }
 0x4dc   : > { %1556 = vsyncadd (%p1201_p1), %s893_s8, 4294967168  ;;  %s25_s6 = sadd.s32 1, %s1611_s6   ;;  %s2072_s18 = sld [smem:[#allocation14_spill]] }
 0x4dd   : > { %p1954_p2 = scmp.ge.s32.totalorder %s25_s6, 6   ;;  %s2073_s28 = sld [smem:[#allocation17_spill]] }
 0x4de   : > { %s2074_s16 = sld [smem:[#allocation21_spill]]  ;;  %s2077_s19 = smov %s1567_s20 }
 0x4df   : > { %s2075_s30 = sld [smem:[#allocation22_spill]]  ;;  %s2078_s20 = smov %s1808_s10 }
 0x4e0   : > { %s2079_s21 = smov %s1575_s22  ;;  %s2080_s22 = smov %s1579_s23 }
 0x4e1   : > { %s2081_s23 = smov %s1802_s13  ;;  %s2082_s24 = smov %s1587_s25 }
 0x4e2   : > { %s2083_s25 = smov %s1591_s26  ;;  %s2084_s26 = smov %s1805_s4 }
 0x4e3   : > { %s2085_s27 = smov %s1603_s29  ;;  %24 = sbr.rel (!%p1954_p2) target bundleno = 18 (0x12), region = 121 }
 0x4e4   : > { %s2086_s29 = smov %s2074_s16 }
 0x4e8   :  { %905 = vsyncpa [#allocation3], 1 }
 0x4e9   :  { %907 = vsyncpa [#allocation3 + $0x1], 1 }
 0x4ea   :  { %908 = vsyncpa [#allocation6], 1 }
 0x4eb   :  { %910 = vsyncpa [#allocation6 + $0x1], 1 }
 0x4ec   :  { %911 = vsyncpa [#allocation4], 1 }
 0x4ed   :  { %913 = vsyncpa [#allocation4 + $0x1], 1 }

</bundles_post_ra>
